<compile_context>
chip_gen: v6e
topology: v6e:2x2x1
jax: 0.10.0
libtpu: 0.0.40
codegen_flags: <defaults>
</compile_context>

<pallas_src>
import functools

import jax
import jax.numpy as jnp
from jax.experimental import pallas as pl
from jax.experimental.pallas import tpu as pltpu


def _ae_kernel(x_ref, w1_ref, b1_ref, w23_ref, b23_ref, w4_ref, b4_ref,
               part_ref, *, tile_b, n_valid_rows, compute_dtype):
    x = x_ref[...]                                      # (TB, D) float32
    xm = x.astype(compute_dtype)

    # ---- encoder: Linear(D->H) + LeakyReLU(0.01) ----
    h = jnp.dot(xm, w1_ref[...], preferred_element_type=jnp.float32) + b1_ref[...]
    h = jnp.where(h > 0, h, 0.01 * h)

    # ---- fused bottleneck: Linear(H->L) . Linear(L->H), then LeakyReLU ----
    d = jnp.dot(h.astype(compute_dtype), w23_ref[...],
                preferred_element_type=jnp.float32) + b23_ref[...]
    d = jnp.where(d > 0, d, 0.01 * d)

    # ---- decoder output: Linear(H->D) ----
    x_hat = jnp.dot(d.astype(compute_dtype), w4_ref[...],
                    preferred_element_type=jnp.float32) + b4_ref[...]

    # ---- per-tile, per-feature partial sum of squared error (float32) ----
    diff = x - x_hat
    if n_valid_rows is not None:                        # mask padded batch rows
        row = (pl.program_id(0) * tile_b
               + jax.lax.broadcasted_iota(jnp.int32, diff.shape, 0))
        diff = jnp.where(row < n_valid_rows, diff, 0.0)
    sq = diff * diff
    part_ref[...] = jnp.sum(sq, axis=0, keepdims=True).reshape(1, 1, diff.shape[1])


def base_ae_forward(x, params, *, block_b=256, use_bf16=True):
    """Full BaseAE forward pass (returns scalar reconstruction MSE).

    x: (B, input_dim) float32
    params: dict with w1 (D,H), b1 (1,H), w2 (H,L), b2 (1,L),
                       w3 (L,H), b3 (1,H), w4 (H,D), b4 (1,D)
    """
    B, D = x.shape
    H = params["w1"].shape[1]

    # --- host-side param prep: fuse the latent bottleneck ------------------
    w23 = params["w2"] @ params["w3"]                       # (H, H)
    b23 = params["b2"] @ params["w3"] + params["b3"]        # (1, H)

    cdt = jnp.bfloat16 if use_bf16 else jnp.float32
    w1 = params["w1"].astype(cdt)
    w23 = w23.astype(cdt)
    w4 = params["w4"].astype(cdt)
    b1 = params["b1"].astype(jnp.float32)
    b23 = b23.astype(jnp.float32)
    b4 = params["b4"].astype(jnp.float32)

    # --- batch tiling -------------------------------------------------------
    tb = min(block_b, ((B + 7) // 8) * 8)       # rows per tile, multiple of 8
    b_pad = pl.cdiv(B, tb) * tb
    n_tiles = b_pad // tb
    x_in = jnp.pad(x, ((0, b_pad - B), (0, 0))) if b_pad != B else x

    kernel = functools.partial(
        _ae_kernel,
        tile_b=tb,
        n_valid_rows=(B if b_pad != B else None),
        compute_dtype=cdt,
    )

    weight_bytes = (w1.size + w23.size + w4.size) * (2 if use_bf16 else 4)
    cost = pl.CostEstimate(
        flops=2 * b_pad * (D * H + H * H + H * D),
        transcendentals=0,
        bytes_accessed=x_in.size * 4 + weight_bytes + n_tiles * D * 4,
    )

    def resident(shape):
        return pl.BlockSpec(shape, lambda i: tuple(0 for _ in shape))

    partials = pl.pallas_call(
        kernel,
        out_shape=jax.ShapeDtypeStruct((n_tiles, 1, D), jnp.float32),
        grid_spec=pltpu.PrefetchScalarGridSpec(
            num_scalar_prefetch=0,
            grid=(n_tiles,),
            in_specs=[
                pl.BlockSpec((tb, D), lambda i: (i, 0)),    # x tile (pipelined)
                resident((D, H)), resident((1, H)),         # w1, b1 (resident)
                resident((H, H)), resident((1, H)),         # w23, b23
                resident((H, D)), resident((1, D)),         # w4, b4
            ],
            out_specs=pl.BlockSpec((1, 1, D), lambda i: (i, 0, 0)),
        ),
        compiler_params=pltpu.CompilerParams(
            dimension_semantics=("parallel",),
        ),
        cost_estimate=cost,
    )(x_in, w1, b1, w23, b23, w4, b4)

    # Final scalar mean over the *actual* B*D elements (padded rows are zeroed).
    return jnp.sum(partials) / (B * D)


def init_params(key, input_dim, hidden_dim, latent_dim):
    """Deterministic init mimicking torch.nn.Linear (uniform +/- 1/sqrt(fan_in))."""
    ks = jax.random.split(key, 8)

    def linear(kw, kb, fan_in, fan_out):
        bound = 1.0 / jnp.sqrt(float(fan_in))
        w = jax.random.uniform(kw, (fan_in, fan_out), jnp.float32, -bound, bound)
        b = jax.random.uniform(kb, (1, fan_out), jnp.float32, -bound, bound)
        return w, b

    w1, b1 = linear(ks[0], ks[1], input_dim, hidden_dim)
    w2, b2 = linear(ks[2], ks[3], hidden_dim, latent_dim)
    w3, b3 = linear(ks[4], ks[5], latent_dim, hidden_dim)
    w4, b4 = linear(ks[6], ks[7], hidden_dim, input_dim)
    return dict(w1=w1, b1=b1, w2=w2, b2=b2, w3=w3, b3=b3, w4=w4, b4=b4)


def _reference(x, p):
    """Pure-JAX f32 reference of the module's forward pass (unfused)."""
    h_pre = x @ p["w1"] + p["b1"]
    h = jnp.where(h_pre > 0, h_pre, 0.01 * h_pre)
    z = h @ p["w2"] + p["b2"]
    d_pre = z @ p["w3"] + p["b3"]
    d = jnp.where(d_pre > 0, d_pre, 0.01 * d_pre)
    x_hat = d @ p["w4"] + p["b4"]
    return jnp.mean((x - x_hat) ** 2)


if __name__ == "__main__":
    B, INPUT_DIM, HIDDEN_DIM, LATENT_DIM = 8, 64, 256, 32

    key = jax.random.PRNGKey(0)
    k_x, k_p = jax.random.split(key)
    x = jax.random.normal(k_x, (B, INPUT_DIM), dtype=jnp.float32)
    params = init_params(k_p, INPUT_DIM, HIDDEN_DIM, LATENT_DIM)

    loss = jax.block_until_ready(base_ae_forward(x, params))
    ref = jax.block_until_ready(_reference(x, params))
    assert jnp.isfinite(loss), "loss is not finite"
    # bf16 MXU inputs (f32 accumulation) -> slightly looser tolerance vs f32 ref
    assert jnp.abs(loss - ref) < 3e-2 * (1.0 + jnp.abs(ref)), (loss, ref)

    # Exercise the multi-tile grid + padded-batch masking path.
    B2 = 20
    x2 = jax.random.normal(jax.random.PRNGKey(1), (B2, INPUT_DIM), dtype=jnp.float32)
    loss2 = jax.block_until_ready(base_ae_forward(x2, params, block_b=8))
    ref2 = jax.block_until_ready(_reference(x2, params))
    assert jnp.isfinite(loss2), "loss2 is not finite"
    assert jnp.abs(loss2 - ref2) < 3e-2 * (1.0 + jnp.abs(ref2)), (loss2, ref2)

    print("KERNEL_OK")
</pallas_src>

<mosaic_0001>
module attributes {stable_mosaic.version = 11 : i64} {
  func.func @_ae_kernel(%arg0: i32, %arg1: memref<8x64xf32, #tpu.memory_space<vmem>>, %arg2: memref<64x256xbf16, #tpu.memory_space<vmem>>, %arg3: memref<1x256xf32, #tpu.memory_space<vmem>>, %arg4: memref<256x256xbf16, #tpu.memory_space<vmem>>, %arg5: memref<1x256xf32, #tpu.memory_space<vmem>>, %arg6: memref<256x64xbf16, #tpu.memory_space<vmem>>, %arg7: memref<1x64xf32, #tpu.memory_space<vmem>>, %arg8: memref<1x1x64xf32, #tpu.memory_space<vmem>>) attributes {dimension_semantics = [#tpu.dimension_semantics<parallel>], iteration_bounds = array<i64: 1>, scalar_prefetch = 0 : i64, scratch_operands = 0 : i64, tpu.core_type = #tpu.core_type<tc>, window_params = [{transform_indices = @transform_0, window_bounds = array<i64: 8, 64>}, {pipeline_mode = #tpu.pipeline_mode<synchronous>, transform_indices = @transform_1, window_bounds = array<i64: 64, 256>}, {pipeline_mode = #tpu.pipeline_mode<synchronous>, transform_indices = @transform_2, window_bounds = array<i64: 1, 256>}, {pipeline_mode = #tpu.pipeline_mode<synchronous>, transform_indices = @transform_3, window_bounds = array<i64: 256, 256>}, {pipeline_mode = #tpu.pipeline_mode<synchronous>, transform_indices = @transform_4, window_bounds = array<i64: 1, 256>}, {pipeline_mode = #tpu.pipeline_mode<synchronous>, transform_indices = @transform_5, window_bounds = array<i64: 256, 64>}, {pipeline_mode = #tpu.pipeline_mode<synchronous>, transform_indices = @transform_6, window_bounds = array<i64: 1, 64>}, {transform_indices = @transform_7, window_bounds = array<i64: 1, 1, 64>}]} {
    %c0 = arith.constant 0 : index
    %c0_0 = arith.constant 0 : index
    %0 = vector.load %arg1[%c0, %c0_0] : memref<8x64xf32, #tpu.memory_space<vmem>>, vector<8x64xf32>
    %1 = arith.truncf %0 : vector<8x64xf32> to vector<8x64xbf16>
    %c0_1 = arith.constant 0 : index
    %c0_2 = arith.constant 0 : index
    %2 = vector.load %arg2[%c0_1, %c0_2] : memref<64x256xbf16, #tpu.memory_space<vmem>>, vector<64x256xbf16>
    %cst = arith.constant dense<0.000000e+00> : vector<8x256xf32>
    %3 = tpu.matmul %1, %2, %cst {dimension_numbers = #tpu.dot_dimension_numbers<[1], [0], [0], [1], [0, 0, 1, 1], [], []>} : vector<8x64xbf16>, vector<64x256xbf16>, vector<8x256xf32> -> vector<8x256xf32>
    %c0_3 = arith.constant 0 : index
    %c0_4 = arith.constant 0 : index
    %4 = vector.load %arg3[%c0_3, %c0_4] : memref<1x256xf32, #tpu.memory_space<vmem>>, vector<1x256xf32>
    %5 = vector.broadcast %4 : vector<1x256xf32> to vector<8x256xf32>
    %6 = arith.addf %3, %5 : vector<8x256xf32>
    %cst_5 = arith.constant 0.000000e+00 : f32
    %7 = vector.broadcast %cst_5 : f32 to vector<8x256xf32>
    %8 = arith.cmpf ogt, %6, %7 : vector<8x256xf32>
    %cst_6 = arith.constant 0.00999999977 : f32
    %9 = vector.broadcast %cst_6 : f32 to vector<8x256xf32>
    %10 = arith.mulf %9, %6 : vector<8x256xf32>
    %11 = arith.select %8, %6, %10 : vector<8x256xi1>, vector<8x256xf32>
    %12 = arith.truncf %11 : vector<8x256xf32> to vector<8x256xbf16>
    %c0_7 = arith.constant 0 : index
    %c0_8 = arith.constant 0 : index
    %13 = vector.load %arg4[%c0_7, %c0_8] : memref<256x256xbf16, #tpu.memory_space<vmem>>, vector<256x256xbf16>
    %cst_9 = arith.constant dense<0.000000e+00> : vector<8x256xf32>
    %14 = tpu.matmul %12, %13, %cst_9 {dimension_numbers = #tpu.dot_dimension_numbers<[1], [0], [0], [1], [0, 0, 1, 1], [], []>} : vector<8x256xbf16>, vector<256x256xbf16>, vector<8x256xf32> -> vector<8x256xf32>
    %c0_10 = arith.constant 0 : index
    %c0_11 = arith.constant 0 : index
    %15 = vector.load %arg5[%c0_10, %c0_11] : memref<1x256xf32, #tpu.memory_space<vmem>>, vector<1x256xf32>
    %16 = vector.broadcast %15 : vector<1x256xf32> to vector<8x256xf32>
    %17 = arith.addf %14, %16 : vector<8x256xf32>
    %cst_12 = arith.constant 0.000000e+00 : f32
    %18 = vector.broadcast %cst_12 : f32 to vector<8x256xf32>
    %19 = arith.cmpf ogt, %17, %18 : vector<8x256xf32>
    %cst_13 = arith.constant 0.00999999977 : f32
    %20 = vector.broadcast %cst_13 : f32 to vector<8x256xf32>
    %21 = arith.mulf %20, %17 : vector<8x256xf32>
    %22 = arith.select %19, %17, %21 : vector<8x256xi1>, vector<8x256xf32>
    %23 = arith.truncf %22 : vector<8x256xf32> to vector<8x256xbf16>
    %c0_14 = arith.constant 0 : index
    %c0_15 = arith.constant 0 : index
    %24 = vector.load %arg6[%c0_14, %c0_15] : memref<256x64xbf16, #tpu.memory_space<vmem>>, vector<256x64xbf16>
    %cst_16 = arith.constant dense<0.000000e+00> : vector<8x64xf32>
    %25 = tpu.matmul %23, %24, %cst_16 {dimension_numbers = #tpu.dot_dimension_numbers<[1], [0], [0], [1], [0, 0, 1, 1], [], []>} : vector<8x256xbf16>, vector<256x64xbf16>, vector<8x64xf32> -> vector<8x64xf32>
    %c0_17 = arith.constant 0 : index
    %c0_18 = arith.constant 0 : index
    %26 = vector.load %arg7[%c0_17, %c0_18] : memref<1x64xf32, #tpu.memory_space<vmem>>, vector<1x64xf32>
    %27 = vector.broadcast %26 : vector<1x64xf32> to vector<8x64xf32>
    %28 = arith.addf %25, %27 : vector<8x64xf32>
    %29 = arith.subf %0, %28 : vector<8x64xf32>
    %30 = arith.mulf %29, %29 : vector<8x64xf32>
    %cst_19 = arith.constant dense<0.000000e+00> : vector<64xf32>
    %31 = vector.multi_reduction <add>, %30, %cst_19 [0] : vector<8x64xf32> to vector<64xf32>
    %32 = vector.shape_cast %31 : vector<64xf32> to vector<1x64xf32>
    %33 = vector.shape_cast %32 : vector<1x64xf32> to vector<1x1x64xf32>
    %c0_20 = arith.constant 0 : index
    %c0_21 = arith.constant 0 : index
    %c0_22 = arith.constant 0 : index
    %34 = vector.load %arg8[%c0_20, %c0_21, %c0_22] : memref<1x1x64xf32, #tpu.memory_space<vmem>>, vector<1x1x64xf32>
    tpu.vector_store %arg8[%c0_20, %c0_21, %c0_22], %33 {strides = array<i32>} : memref<1x1x64xf32, #tpu.memory_space<vmem>>, vector<1x1x64xf32>,
    return
  }
  func.func @transform_0(%arg0: i32) -> (i32, i32) {
    %c0_i32 = arith.constant 0 : i32
    %c0_i32_0 = arith.constant 0 : i32
    return %arg0, %c0_i32 : i32, i32
  }
  func.func @transform_1(%arg0: i32) -> (i32, i32) {
    %c0_i32 = arith.constant 0 : i32
    %c0_i32_0 = arith.constant 0 : i32
    %c0_i32_1 = arith.constant 0 : i32
    return %c0_i32, %c0_i32_0 : i32, i32
  }
  func.func @transform_2(%arg0: i32) -> (i32, i32) {
    %c0_i32 = arith.constant 0 : i32
    %c0_i32_0 = arith.constant 0 : i32
    %c0_i32_1 = arith.constant 0 : i32
    return %c0_i32, %c0_i32_0 : i32, i32
  }
  func.func @transform_3(%arg0: i32) -> (i32, i32) {
    %c0_i32 = arith.constant 0 : i32
    %c0_i32_0 = arith.constant 0 : i32
    %c0_i32_1 = arith.constant 0 : i32
    return %c0_i32, %c0_i32_0 : i32, i32
  }
  func.func @transform_4(%arg0: i32) -> (i32, i32) {
    %c0_i32 = arith.constant 0 : i32
    %c0_i32_0 = arith.constant 0 : i32
    %c0_i32_1 = arith.constant 0 : i32
    return %c0_i32, %c0_i32_0 : i32, i32
  }
  func.func @transform_5(%arg0: i32) -> (i32, i32) {
    %c0_i32 = arith.constant 0 : i32
    %c0_i32_0 = arith.constant 0 : i32
    %c0_i32_1 = arith.constant 0 : i32
    return %c0_i32, %c0_i32_0 : i32, i32
  }
  func.func @transform_6(%arg0: i32) -> (i32, i32) {
    %c0_i32 = arith.constant 0 : i32
    %c0_i32_0 = arith.constant 0 : i32
    %c0_i32_1 = arith.constant 0 : i32
    return %c0_i32, %c0_i32_0 : i32, i32
  }
  func.func @transform_7(%arg0: i32) -> (i32, i32, i32) {
    %c0_i32 = arith.constant 0 : i32
    %c0_i32_0 = arith.constant 0 : i32
    %c0_i32_1 = arith.constant 0 : i32
    return %arg0, %c0_i32, %c0_i32_0 : i32, i32, i32
  }
}

</mosaic_0001>

<bundles_post_ra>
// kernel: tpu_custom_call.1
= control target key start
LH: loop header
LB: loop body
LE: loop exit
PB: predicated region body
PF: predicated region fallthrough
CT: control target
= control target key end

     0   :  { %12 = vsyncpa [#allocation3], 0  ;;  %s958_s0 = inlined_call_operand.vmem [shape: f32[8,64], index: 0, kind: input, shape index: {}]   ;;  %s959_s1 = inlined_call_operand.vmem [shape: bf16[64,256], index: 1, kind: input, shape index: {}]   ;;  %s960_s2 = inlined_call_operand.vmem [shape: f32[1,256], index: 2, kind: input, shape index: {}]   ;;  %s961_s3 = inlined_call_operand.hbm [shape: bf16[256,256], index: 3, kind: input, shape index: {}]   ;;  %s962_s4 = inlined_call_operand.vmem [shape: f32[1,256], index: 4, kind: input, shape index: {}]   ;;  %s963_s5 = inlined_call_operand.vmem [shape: bf16[256,64], index: 5, kind: input, shape index: {}]   ;;  %s964_s6 = inlined_call_operand.vmem [shape: f32[1,64], index: 6, kind: input, shape index: {}]   ;;  %s965_s7 = inlined_call_operand.hbm [shape: f32[1,1,64], index: 7, kind: output, shape index: {}]  }
   0x1   :  { %13 = vsyncpa [#allocation4], 0  ;;  %s816_s24 = smov [#allocation2]  }
   0x2   :  { %s25_s25 = sshll.u32 %s816_s24, 4  ;;  %s26_s25 = int_to_ptr.vmem [resolvable:$true] %s25_s25 }
   0x3   :  { %s780_s26 = scalar_lea.vmem %s26_s25, 4096  ;;  %p785_p1 = scmp.lt.s32.totalorder %s26_s25, %s26_s25 }
   0x4   :  { %p781_p0 = scmp.ne.s32.totalorder %s26_s25, %s780_s26  ;;  %p786_p2 = scmp.lt.s32.totalorder %s780_s26, %s780_s26 }
   0x6   :  { %p787_p3 = por %p786_p2, %p785_p1 }
   0x8   :  { %p788_p4 = pnand %p787_p3, %p781_p0 }
   0xa   :  { %791 = shalt.err (!%p788_p4)
}
   0xb   :  { %s817_s27 = smov 128   ;;  %s818_s28 = smov 8  }
   0xc   :  { %31 = dma.hbm_to_vmem [thread:$0]  %s961_s3, 4096, %s26_s25, [#allocation3], %s817_s27, %s817_s27, %s818_s28  }
   0xd   :  { %812 = dma.done.wait [#allocation3], 4096  }
   0xe   :  { %813 = vsyncadd [#allocation3], 4294963200  ;;  %v819_v0 = vmov 0   ;;  %v696_v1 = vld [vmem:[%s959_s1 + $0x34] ss:$8 sps:$4 sm:$0xff]   ;;  %v891_v14 = vld [vmem:[%s958_s0] sm:$0xff]  ;;  %v54_v54 = vlaneseq }
   0xf   :  { %140 = vmatprep.mubr.bf16.mxu0 %v819_v0  ;;  %v698_v2 = vld [vmem:[%s959_s1 + $0x30] ss:$8 sps:$4 sm:$0xff]   ;;  %116 = vmatprep.subr.bf16.mxu0 %v696_v1  ;;  %v699_v3 = vld [vmem:[%s959_s1 + $0x24] ss:$8 sps:$4 sm:$0xff]   ;;  %v701_v4 = vld [vmem:[%s959_s1 + $0x20] ss:$8 sps:$4 sm:$0xff]   ;;  %v43_v16 = vpack.c.bf16 %v891_v14, %v891_v14 }
  0x10   :  { %117 = vmatpush1.bf16.msra.mxu0 %v698_v2  ;;  %v702_v5 = vld [vmem:[%s959_s1 + $0x14] ss:$8 sps:$4 sm:$0xff]   ;;  %v704_v6 = vld [vmem:[%s959_s1 + $0x10] ss:$8 sps:$4 sm:$0xff]   ;;  %v711_v9 = vld [vmem:[#allocation2 + $0x64] ss:$8 sps:$4 sm:$0xff]  }
  0x11   :  { %118 = vmatprep.subr.bf16.mxu0 %v699_v3  ;;  %v708_v7 = vld [vmem:[#allocation2 + $0x74] ss:$8 sps:$4 sm:$0xff]   ;;  %v710_v8 = vld [vmem:[#allocation2 + $0x70] ss:$8 sps:$4 sm:$0xff]   ;;  %v705_v10 = vld [vmem:[%s959_s1 + $0x4] ss:$8 sps:$4 sm:$0xff]  }
  0x12   :  { %361 = vmatprep.subr.bf16.mxu1 %v708_v7  ;;  %v713_v11 = vld [vmem:[#allocation2 + $0x60] ss:$8 sps:$4 sm:$0xff]   ;;  %v714_v13 = vld [vmem:[#allocation2 + $0x54] ss:$8 sps:$4 sm:$0xff]   ;;  %v716_v15 = vld [vmem:[#allocation2 + $0x50] ss:$8 sps:$4 sm:$0xff]  }
  0x13   :  { %362 = vmatpush1.bf16.msra.mxu1 %v710_v8  ;;  %v707_v12 = vld [vmem:[%s959_s1] ss:$8 sps:$4 sm:$0xff]   ;;  %v717_v17 = vld [vmem:[#allocation2 + $0x44] ss:$8 sps:$4 sm:$0xff]   ;;  %vm104_vm0 = vcmask 523264   ;;  %v756_v43 = vld [vmem:[%s963_s5 + $0x78] sm:$0xff]  }
  0x14   :  { %119 = vmatpush1.bf16.msra.mxu0 %v701_v4  ;;  %363 = vmatprep.subr.bf16.mxu1 %v711_v9  ;;  %v719_v18 = vld [vmem:[#allocation2 + $0x40] ss:$8 sps:$4 sm:$0xff]   ;;  %v720_v19 = vld [vmem:[#allocation2 + $0x34] ss:$8 sps:$4 sm:$0xff]   ;;  %v722_v20 = vld [vmem:[#allocation2 + $0x30] ss:$8 sps:$4 sm:$0xff]  }
  0x15   :  { %120 = vmatprep.subr.bf16.mxu0 %v702_v5  ;;  %v723_v21 = vld [vmem:[#allocation2 + $0x24] ss:$8 sps:$4 sm:$0xff]   ;;  %v725_v22 = vld [vmem:[#allocation2 + $0x20] ss:$8 sps:$4 sm:$0xff]   ;;  %v726_v23 = vld [vmem:[#allocation2 + $0x14] ss:$8 sps:$4 sm:$0xff]  }
  0x16   :  { %v728_v24 = vld [vmem:[#allocation2 + $0x10] ss:$8 sps:$4 sm:$0xff]   ;;  %v729_v25 = vld [vmem:[#allocation2 + $0x4] ss:$8 sps:$4 sm:$0xff]   ;;  %v731_v26 = vld [vmem:[#allocation2] ss:$8 sps:$4 sm:$0xff]  }
  0x17   :  { %364 = vmatpush1.bf16.msra.mxu1 %v713_v11  ;;  %v732_v27 = vld [vmem:[#allocation2 + $0xf4] ss:$8 sps:$4 sm:$0xff]   ;;  %v734_v28 = vld [vmem:[#allocation2 + $0xf0] ss:$8 sps:$4 sm:$0xff]   ;;  %v735_v29 = vld [vmem:[#allocation2 + $0xe4] ss:$8 sps:$4 sm:$0xff]  }
  0x18   :  { %121 = vmatpush1.bf16.msra.mxu0 %v704_v6  ;;  %365 = vmatprep.subr.bf16.mxu1 %v714_v13  ;;  %v737_v30 = vld [vmem:[#allocation2 + $0xe0] ss:$8 sps:$4 sm:$0xff]   ;;  %v738_v31 = vld [vmem:[#allocation2 + $0xd4] ss:$8 sps:$4 sm:$0xff]   ;;  %v740_v32 = vld [vmem:[#allocation2 + $0xd0] ss:$8 sps:$4 sm:$0xff]  }
  0x19   :  { %122 = vmatprep.subr.bf16.mxu0 %v705_v10  ;;  %v741_v33 = vld [vmem:[#allocation2 + $0xc4] ss:$8 sps:$4 sm:$0xff]   ;;  %v743_v34 = vld [vmem:[#allocation2 + $0xc0] ss:$8 sps:$4 sm:$0xff]   ;;  %v744_v35 = vld [vmem:[#allocation2 + $0xb4] ss:$8 sps:$4 sm:$0xff]  }
  0x1a   :  { %v746_v36 = vld [vmem:[#allocation2 + $0xb0] ss:$8 sps:$4 sm:$0xff]   ;;  %v747_v37 = vld [vmem:[#allocation2 + $0xa4] ss:$8 sps:$4 sm:$0xff]   ;;  %v749_v38 = vld [vmem:[#allocation2 + $0xa0] ss:$8 sps:$4 sm:$0xff]  }
  0x1b   :  { %366 = vmatpush1.bf16.msra.mxu1 %v716_v15  ;;  %v750_v39 = vld [vmem:[#allocation2 + $0x94] ss:$8 sps:$4 sm:$0xff]   ;;  %v752_v40 = vld [vmem:[#allocation2 + $0x90] ss:$8 sps:$4 sm:$0xff]   ;;  %v753_v41 = vld [vmem:[#allocation2 + $0x84] ss:$8 sps:$4 sm:$0xff]  }
  0x1c   :  { %123 = vmatpush1.bf16.msra.mxu0 %v707_v12  ;;  %367 = vmatprep.subr.bf16.mxu1 %v717_v17  ;;  %v755_v42 = vld [vmem:[#allocation2 + $0x80] ss:$8 sps:$4 sm:$0xff]   ;;  %v757_v44 = vld [vmem:[%s963_s5 + $0x38] sm:$0xff]   ;;  %v758_v45 = vld [vmem:[%s963_s5 + $0x70] sm:$0xff]   ;;  %v55_v55 = vshrl.u32 %v54_v54, 7  ;;  %s820_s9 = smov [#allocation5]  }
  0x1d   :  { %669 = vmatprep.subr.bf16.mxu0 %v756_v43  ;;  %v759_v46 = vld [vmem:[%s963_s5 + $0x30] sm:$0xff]   ;;  %v760_v47 = vld [vmem:[%s963_s5 + $0x68] sm:$0xff]   ;;  %v762_v49 = vld [vmem:[%s963_s5 + $0x60] sm:$0xff]   ;;  %s602_s10 = sshll.u32 %s820_s9, 4  ;;  %vm594_vm5 = vcmask 516096   ;;  %s603_s10 = int_to_ptr.vmem [resolvable:$true] %s602_s10 }
  0x1e   :  { %v761_v48 = vld [vmem:[%s963_s5 + $0x28] sm:$0xff]   ;;  %v763_v50 = vld [vmem:[%s963_s5 + $0x20] sm:$0xff]   ;;  %v764_v51 = vld [vmem:[%s963_s5 + $0x58] sm:$0xff]   ;;  %v56_v56 = vsub.s32 0, %v55_v55  ;;  %v60_v58 = vsub.s32 1, %v55_v55  ;;  %s796_s11 = scalar_lea.vmem %s603_s10, 32  ;;  %p797_p6 = scmp.lt.s32.totalorder %s603_s10, %s603_s10 }
  0x1f   :  { %619 = vmatmul.mubr.msk.bf16.vlgmr.msra.gmra.mxu0 %vm104_vm0, %v43_v16  ;;  %368 = vmatpush1.bf16.msra.mxu1 %v719_v18  ;;  %v765_v52 = vld [vmem:[%s963_s5 + $0x18] sm:$0xff]   ;;  %v766_v53 = vld [vmem:[%s963_s5 + $0x50] sm:$0xff]   ;;  %v52_v57 = vld [vmem:[%s960_s2] sm:$0x3] }
  0x20   :  { %369 = vmatprep.subr.bf16.mxu1 %v720_v19  ;;  %670 = vmatpush3.bf16.msra.mxu0 %v757_v44  ;;  %v57_v59 = vrot.slane %v52_v57, %v56_v56  ;;  %v61_v60 = vrot.slane %v52_v57, %v60_v58  ;;  %v767_v9 = vld [vmem:[%s963_s5 + $0x10] sm:$0xff]   ;;  %v768_v10 = vld [vmem:[%s963_s5 + $0x48] sm:$0xff]   ;;  %v770_v12 = vld [vmem:[%s963_s5 + $0x40] sm:$0xff]  }
  0x21   :  { %671 = vmatprep.subr.bf16.mxu0 %v758_v45  ;;  %v769_v11 = vld [vmem:[%s963_s5 + $0x8] sm:$0xff]   ;;  %v771_v13 = vld [vmem:[%s963_s5] sm:$0xff]  }
  0x22   :  { %v189_v15 = vld [vmem:[%s962_s4] sm:$0x3] }
  0x23   :  { %370 = vmatpush1.bf16.msra.mxu1 %v722_v20  ;;  %v194_v16 = vrot.slane %v189_v15, %v56_v56  ;;  %v198_v17 = vrot.slane %v189_v15, %v60_v58 }
  0x24   :  { %371 = vmatprep.subr.bf16.mxu1 %v723_v21  ;;  %672 = vmatpush3.bf16.msra.mxu0 %v759_v46 }
  0x25   :  { %673 = vmatprep.subr.bf16.mxu0 %v760_v47 }
  0x27   :  { %372 = vmatpush1.bf16.msra.mxu1 %v725_v22 }
  0x28   :  { %373 = vmatprep.subr.bf16.mxu1 %v726_v23  ;;  %674 = vmatpush3.bf16.msra.mxu0 %v761_v48 }
  0x29   :  { %675 = vmatprep.subr.bf16.mxu0 %v762_v49 }
  0x2b   :  { %374 = vmatpush1.bf16.msra.mxu1 %v728_v24 }
  0x2c   :  { %375 = vmatprep.subr.bf16.mxu1 %v729_v25  ;;  %676 = vmatpush3.bf16.msra.mxu0 %v763_v50 }
  0x2d   :  { %677 = vmatprep.subr.bf16.mxu0 %v764_v51 }
  0x2f   :  { %376 = vmatpush1.bf16.msra.mxu1 %v731_v26 }
  0x30   :  { %377 = vmatprep.subr.bf16.mxu1 %v732_v27  ;;  %678 = vmatpush3.bf16.msra.mxu0 %v765_v52 }
  0x31   :  { %679 = vmatprep.subr.bf16.mxu0 %v766_v53 }
  0x33   :  { %378 = vmatpush2.bf16.msra.mxu1 %v734_v28 }
  0x34   :  { %379 = vmatprep.subr.bf16.mxu1 %v735_v29  ;;  %680 = vmatpush3.bf16.msra.mxu0 %v767_v9 }
  0x35   :  { %681 = vmatprep.subr.bf16.mxu0 %v768_v10 }
  0x37   :  { %380 = vmatpush2.bf16.msra.mxu1 %v737_v30 }
  0x38   :  { %381 = vmatprep.subr.bf16.mxu1 %v738_v31  ;;  %682 = vmatpush3.bf16.msra.mxu0 %v769_v11  ;;  %v652_v31 = vld [vmem:[%s964_s6] ss:$0 sm:$0xff]  ;;  %s792_s6 = scalar_lea.vmem %s603_s10, 16 }
  0x39   :  { %683 = vmatprep.subr.bf16.mxu0 %v770_v12  ;;  %p793_p5 = scmp.ne.s32.totalorder %s603_s10, %s792_s6  ;;  %p798_p7 = scmp.lt.s32.totalorder %s796_s11, %s792_s6 }
  0x3b   :  { %382 = vmatpush2.bf16.msra.mxu1 %v740_v32  ;;  %p799_p8 = por %p798_p7, %p797_p6 }
  0x3c   :  { %383 = vmatprep.subr.bf16.mxu1 %v741_v33  ;;  %684 = vmatpush3.bf16.msra.mxu0 %v771_v13 }
  0x3d   :  { %p800_p9 = pnand %p799_p8, %p793_p5 }
  0x3f   :  { %384 = vmatpush2.bf16.msra.mxu1 %v743_v34 }
  0x40   :  { %385 = vmatprep.subr.bf16.mxu1 %v744_v35 }
  0x43   :  { %386 = vmatpush2.bf16.msra.mxu1 %v746_v36 }
  0x44   :  { %387 = vmatprep.subr.bf16.mxu1 %v747_v37 }
  0x47   :  { %388 = vmatpush2.bf16.msra.mxu1 %v749_v38 }
  0x48   :  { %389 = vmatprep.subr.bf16.mxu1 %v750_v39 }
  0x4b   :  { %390 = vmatpush2.bf16.msra.mxu1 %v752_v40 }
  0x4c   :  { %391 = vmatprep.subr.bf16.mxu1 %v753_v41 }
  0x4f   :  { %392 = vmatpush2.bf16.msra.mxu1 %v755_v42 }
  0xdf   :  { %v142_v61 = vpop.f32.mrf.mxu0 }
  0xe0   :  { %v143_v62 = vadd.f32 %v142_v61, %v57_v59 }
  0xe1   :  { %v144_v63 = vpop.f32.mrf.mxu0 }
  0xe2   :  { %vm149_vm1 = vcmp.gt.f32.partialorder %v143_v62, 0.0  ;;  %v151_v0 = vmul.f32 0.01, %v143_v62  ;;  %v145_v1 = vadd.f32 %v144_v63, %v61_v60 }
  0xe3   :  { %v146_v2 = vpop.f32.mrf.mxu0 }
  0xe4   :  { %vm150_vm2 = vcmp.gt.f32.partialorder %v145_v1, 0.0  ;;  %v152_v3 = vmul.f32 0.01, %v145_v1  ;;  %v153_v5 = vsel %vm149_vm1, %v143_v62, %v151_v0 }
  0xe5   :  { %v147_v4 = vpop.f32.mrf.mxu0  ;;  %v155_v8 = vpack.c.bf16 %v153_v5, %v153_v5 }
  0xe6   :  { %v154_v6 = vsel %vm150_vm2, %v145_v1, %v152_v3 }
  0xe7   :  { %v156_v7 = vpack.c.bf16 %v154_v6, %v154_v6 }
  0xe9   :  { %393 = vmatprep.mubr.bf16.mxu1 %v156_v7 }
  0xea   :  { %394 = vmatmul.mubr.bf16.vlgmr.msra.gmra.mxu1 %v155_v8 }
 0x1aa   :  { %v395_v18 = vpop.f32.mrf.mxu1 }
 0x1ab   :  { %v396_v19 = vadd.f32 %v395_v18, %v194_v16 }
 0x1ac   :  { %v397_v20 = vpop.f32.mrf.mxu1 }
 0x1ad   :  { %vm402_vm3 = vcmp.gt.f32.partialorder %v396_v19, 0.0  ;;  %v404_v21 = vmul.f32 0.01, %v396_v19  ;;  %v398_v22 = vadd.f32 %v397_v20, %v198_v17 }
 0x1ae   :  { %v399_v23 = vpop.f32.mrf.mxu1 }
 0x1af   :  { %vm403_vm4 = vcmp.gt.f32.partialorder %v398_v22, 0.0  ;;  %v405_v24 = vmul.f32 0.01, %v398_v22  ;;  %v406_v25 = vsel %vm402_vm3, %v396_v19, %v404_v21 }
 0x1b0   :  { %v400_v26 = vpop.f32.mrf.mxu1  ;;  %v408_v29 = vpack.c.bf16 %v406_v25, %v406_v25 }
 0x1b1   :  { %v407_v27 = vsel %vm403_vm4, %v398_v22, %v405_v24 }
 0x1b2   :  { %v409_v28 = vpack.c.bf16 %v407_v27, %v407_v27 }
 0x1b4   :  { %577 = vmatprep.mubr.bf16.mxu0 %v409_v28 }
 0x1b5   :  { %578 = vmatmul.mubr.bf16.vlgmr.msra.gmra.mxu0 %v408_v29 }
 0x275   :  { %v685_v30 = vpop.f32.mrf.mxu0 }
 0x277   :  { %v686_v32 = vpop.f32.mrf.mxu0 }
 0x278   :  { %v687_v33 = vadd.f32 %v686_v32, %v685_v30 }
 0x279   :  { %v688_v34 = vpop.f32.mrf.mxu0 }
 0x27a   :  { %v580_v35 = vadd.f32 %v687_v33, %v652_v31 }
 0x27b   :  { %v689_v36 = vpop.f32.mrf.mxu0 }
 0x27c   :  { %v585_v37 = vsub.f32 %v891_v14, %v580_v35 }
 0x27e   :  { %v586_v38 = vmul.f32 %v585_v37, %v585_v37 }
 0x280   :  { %v587_v39 = vsel %vm104_vm0, %v586_v38, 0.0 }
 0x281   :  { %v588_v40 = vrot.slane %v587_v39, 4 }
 0x283   :  { %v589_v41 = vadd.f32 %v588_v40, %v587_v39 }
 0x285   :  { %v590_v42 = vrot.slane %v589_v41, 2 }
 0x287   :  { %v591_v43 = vadd.f32 %v590_v42, %v589_v41 }
 0x289   :  { %v592_v44 = vrot.slane %v591_v43, 1 }
 0x28b   :  { %v593_v45 = vadd.f32 %v592_v44, %v591_v43 }
 0x28d   :  { %595 = vst.msk [vmem:[#allocation5] sm:$0x1] %vm594_vm5, %v593_v45 }
 0x28e   :  { %803 = shalt.err (!%p800_p9)
}
 0x28f   :  { %605 = dma.vmem_to_hbm [thread:$0]  %s603_s10, 16, %s965_s7, [#allocation4]  }
 0x290   :  { %814 = dma.done.wait [#allocation4], 16  }
 0x291   :  { %815 = vsyncadd [#allocation4], 4294967280 }
 0x292   :  { %609 = vsyncpa [#allocation3], 1 }
 0x293   :  { %610 = vsyncpa [#allocation4], 1 }

</bundles_post_ra>
